<compile_context>
chip_gen: v7x
topology: tpu7x:2x2x1
jax: 0.10.0
libtpu: 0.0.40
codegen_flags: <defaults>
</compile_context>

<pallas_src>
import functools

import jax
import jax.numpy as jnp
from jax.experimental import pallas as pl
from jax.experimental.pallas import tpu as pltpu

# True (logical) dims of the PyTorch module.
D_IN, D_H1, D_H2, D_H3, D_OUT = 784, 100, 60, 20, 10
# 128-aligned (padded) hidden/output dims used inside the kernel.
P_H1, P_H2, P_H3, P_OUT = 128, 128, 128, 128


def _round_up(n, m):
    return ((n + m - 1) // m) * m


def _use_bf16_activations():
    """bf16 VPU/EUP exists on v6e/v7x; v5e (and unknown) fall back to f32 sigmoid."""
    try:
        kind = jax.devices()[0].device_kind.lower()
    except Exception:
        return False
    return ("v6" in kind) or ("v7" in kind)


def _activation(h_f32, bf16_act):
    """sigmoid(x) = 0.5 * tanh(0.5 * x) + 0.5; returns bf16 for the next MXU matmul."""
    if bf16_act:
        half = jnp.bfloat16(0.5)
        hb = h_f32.astype(jnp.bfloat16)
        return jnp.tanh(hb * half) * half + half
    return jax.nn.sigmoid(h_f32).astype(jnp.bfloat16)


def mlp_kernel(x_ref,
               w1_ref, b1_ref,
               w2_ref, b2_ref,
               w3_ref, b3_ref,
               w4_ref, b4_ref,
               o_ref, *, bf16_act):
    """One batch tile: 4 MXU matmuls (bf16 in, f32 acc), f32 bias add, bf16 out."""
    x = x_ref[...].astype(jnp.bfloat16)                              # (TB, 784)

    h = jnp.dot(x, w1_ref[...], preferred_element_type=jnp.float32) + b1_ref[...]
    h = _activation(h, bf16_act)                                     # (TB, 128) bf16

    h = jnp.dot(h, w2_ref[...], preferred_element_type=jnp.float32) + b2_ref[...]
    h = _activation(h, bf16_act)

    h = jnp.dot(h, w3_ref[...], preferred_element_type=jnp.float32) + b3_ref[...]
    h = _activation(h, bf16_act)

    h = jnp.dot(h, w4_ref[...], preferred_element_type=jnp.float32) + b4_ref[...]
    o_ref[...] = h.astype(o_ref.dtype)                               # (TB, 128) bf16


def pad_params_for_kernel(params):
    """Zero-pad weights/biases to 128-aligned output lanes (input dim of layer 1
    stays 784); weights -> bf16, biases stay f32. Call ONCE at init."""
    padded_dims = [(D_IN, P_H1), (P_H1, P_H2), (P_H2, P_H3), (P_H3, P_OUT)]
    out = []
    for (w, b), (pi, po) in zip(params, padded_dims):
        wp = jnp.zeros((pi, po), jnp.float32).at[:w.shape[0], :w.shape[1]].set(w)
        bp = jnp.zeros((1, po), jnp.float32).at[:, :b.shape[1]].set(b)
        out.append((wp.astype(jnp.bfloat16), bp))
    return tuple(out)


@functools.partial(jax.jit, static_argnames=("tb_cap",))
def mnist_net_forward(x, padded_params, *, tb_cap=1024):
    """x: (B, 784) float32; padded_params: output of pad_params_for_kernel."""
    B = x.shape[0]
    (w1, b1), (w2, b2), (w3, b3), (w4, b4) = padded_params

    # Target >= 4 grid steps (v7x megacore + DMA/compute overlap), TB multiple of 8,
    # capped at tb_cap so double-buffered tiles stay far below v7x's 64 MiB VMEM.
    TB = min(tb_cap, max(8, _round_up(pl.cdiv(B, 4), 8)))
    B_pad = _round_up(B, TB)
    if B_pad != B:
        x = jnp.pad(x, ((0, B_pad - B), (0, 0)))   # batch-only pad, no feature pad/cast

    const = lambda i: (0, 0)   # weights / biases: resident in VMEM across all tiles
    kernel = functools.partial(mlp_kernel, bf16_act=_use_bf16_activations())

    out_padded = pl.pallas_call(
        kernel,
        out_shape=jax.ShapeDtypeStruct((B_pad, P_OUT), jnp.bfloat16),
        grid=(pl.cdiv(B_pad, TB),),
        in_specs=[
            pl.BlockSpec((TB, D_IN), lambda i: (i, 0)),   # raw f32 input, 784 = full dim
            pl.BlockSpec((D_IN, P_H1), const), pl.BlockSpec((1, P_H1), const),
            pl.BlockSpec((P_H1, P_H2), const), pl.BlockSpec((1, P_H2), const),
            pl.BlockSpec((P_H2, P_H3), const), pl.BlockSpec((1, P_H3), const),
            pl.BlockSpec((P_H3, P_OUT), const), pl.BlockSpec((1, P_OUT), const),
        ],
        out_specs=pl.BlockSpec((TB, P_OUT), lambda i: (i, 0)),
        compiler_params=pltpu.CompilerParams(
            dimension_semantics=("parallel",),
            vmem_limit_bytes=32 * 1024 * 1024,
        ),
    )(x, w1, b1, w2, b2, w3, b3, w4, b4)

    # Tiny epilogue: keep logical (B, 10) logits; cast back to f32 for consumers.
    return out_padded[:B, :D_OUT].astype(jnp.float32)


def init_params(key):
    """Deterministic init matching nn.Linear default scale.
    Weights are stored transposed vs PyTorch: (in_features, out_features)."""
    dims = [(D_IN, D_H1), (D_H1, D_H2), (D_H2, D_H3), (D_H3, D_OUT)]
    params = []
    for fan_in, fan_out in dims:
        kw, kb, key = jax.random.split(key, 3)
        bound = 1.0 / jnp.sqrt(fan_in)
        w = jax.random.uniform(kw, (fan_in, fan_out), jnp.float32, -bound, bound)
        b = jax.random.uniform(kb, (1, fan_out), jnp.float32, -bound, bound)
        params.append((w, b))
    return params


def reference_forward(x, params):
    (w1, b1), (w2, b2), (w3, b3), (w4, b4) = params
    h = jax.nn.sigmoid(x @ w1 + b1)
    h = jax.nn.sigmoid(h @ w2 + b2)
    h = jax.nn.sigmoid(h @ w3 + b3)
    return h @ w4 + b4


if __name__ == "__main__":
    key = jax.random.PRNGKey(0)
    kx, kp = jax.random.split(key)

    B = 8
    x = jax.random.normal(kx, (B, D_IN), jnp.float32)
    params = init_params(kp)
    padded_params = pad_params_for_kernel(params)   # once, outside the jitted forward

    out = mnist_net_forward(x, padded_params)
    out = jax.block_until_ready(out)

    ref = reference_forward(x, params)  # f32 reference
    assert out.shape == (B, D_OUT)
    # bf16 MXU inputs / activations / output store -> relaxed tolerance vs f32 ref.
    assert jnp.allclose(out, ref, atol=7.5e-2, rtol=5e-2), (
        f"max abs err {jnp.max(jnp.abs(out - ref))}")

    print("KERNEL_OK")
</pallas_src>

<mosaic_0001>
module attributes {stable_mosaic.version = 11 : i64} {
  func.func @mlp_kernel(%arg0: i32, %arg1: memref<8x784xf32, #tpu.memory_space<vmem>>, %arg2: memref<784x128xbf16, #tpu.memory_space<vmem>>, %arg3: memref<1x128xf32, #tpu.memory_space<vmem>>, %arg4: memref<128x128xbf16, #tpu.memory_space<vmem>>, %arg5: memref<1x128xf32, #tpu.memory_space<vmem>>, %arg6: memref<128x128xbf16, #tpu.memory_space<vmem>>, %arg7: memref<1x128xf32, #tpu.memory_space<vmem>>, %arg8: memref<128x128xbf16, #tpu.memory_space<vmem>>, %arg9: memref<1x128xf32, #tpu.memory_space<vmem>>, %arg10: memref<8x128xbf16, #tpu.memory_space<vmem>>) attributes {dimension_semantics = [#tpu.dimension_semantics<parallel>], iteration_bounds = array<i64: 1>, scalar_prefetch = 0 : i64, scratch_operands = 0 : i64, tpu.core_type = #tpu.core_type<tc>, window_params = [{transform_indices = @transform_0, window_bounds = array<i64: 8, 784>}, {pipeline_mode = #tpu.pipeline_mode<synchronous>, transform_indices = @transform_1, window_bounds = array<i64: 784, 128>}, {pipeline_mode = #tpu.pipeline_mode<synchronous>, transform_indices = @transform_2, window_bounds = array<i64: 1, 128>}, {pipeline_mode = #tpu.pipeline_mode<synchronous>, transform_indices = @transform_3, window_bounds = array<i64: 128, 128>}, {pipeline_mode = #tpu.pipeline_mode<synchronous>, transform_indices = @transform_4, window_bounds = array<i64: 1, 128>}, {pipeline_mode = #tpu.pipeline_mode<synchronous>, transform_indices = @transform_5, window_bounds = array<i64: 128, 128>}, {pipeline_mode = #tpu.pipeline_mode<synchronous>, transform_indices = @transform_6, window_bounds = array<i64: 1, 128>}, {pipeline_mode = #tpu.pipeline_mode<synchronous>, transform_indices = @transform_7, window_bounds = array<i64: 128, 128>}, {pipeline_mode = #tpu.pipeline_mode<synchronous>, transform_indices = @transform_8, window_bounds = array<i64: 1, 128>}, {transform_indices = @transform_9, window_bounds = array<i64: 8, 128>}]} {
    %c0 = arith.constant 0 : index
    %c0_0 = arith.constant 0 : index
    %0 = vector.load %arg1[%c0, %c0_0] : memref<8x784xf32, #tpu.memory_space<vmem>>, vector<8x784xf32>
    %1 = arith.truncf %0 : vector<8x784xf32> to vector<8x784xbf16>
    %c0_1 = arith.constant 0 : index
    %c0_2 = arith.constant 0 : index
    %2 = vector.load %arg2[%c0_1, %c0_2] : memref<784x128xbf16, #tpu.memory_space<vmem>>, vector<784x128xbf16>
    %cst = arith.constant dense<0.000000e+00> : vector<8x128xf32>
    %3 = tpu.matmul %1, %2, %cst {dimension_numbers = #tpu.dot_dimension_numbers<[1], [0], [0], [1], [0, 0, 1, 1], [], []>} : vector<8x784xbf16>, vector<784x128xbf16>, vector<8x128xf32> -> vector<8x128xf32>
    %c0_3 = arith.constant 0 : index
    %c0_4 = arith.constant 0 : index
    %4 = vector.load %arg3[%c0_3, %c0_4] : memref<1x128xf32, #tpu.memory_space<vmem>>, vector<1x128xf32>
    %5 = vector.broadcast %4 : vector<1x128xf32> to vector<8x128xf32>
    %6 = arith.addf %3, %5 : vector<8x128xf32>
    %7 = arith.negf %6 : vector<8x128xf32>
    %8 = math.exp %7 : vector<8x128xf32>
    %cst_5 = arith.constant 1.000000e+00 : f32
    %9 = vector.broadcast %cst_5 : f32 to vector<8x128xf32>
    %10 = arith.addf %9, %8 : vector<8x128xf32>
    %11 = arith.divf %9, %10 : vector<8x128xf32>
    %12 = arith.truncf %11 : vector<8x128xf32> to vector<8x128xbf16>
    %c0_6 = arith.constant 0 : index
    %c0_7 = arith.constant 0 : index
    %13 = vector.load %arg4[%c0_6, %c0_7] : memref<128x128xbf16, #tpu.memory_space<vmem>>, vector<128x128xbf16>
    %cst_8 = arith.constant dense<0.000000e+00> : vector<8x128xf32>
    %14 = tpu.matmul %12, %13, %cst_8 {dimension_numbers = #tpu.dot_dimension_numbers<[1], [0], [0], [1], [0, 0, 1, 1], [], []>} : vector<8x128xbf16>, vector<128x128xbf16>, vector<8x128xf32> -> vector<8x128xf32>
    %c0_9 = arith.constant 0 : index
    %c0_10 = arith.constant 0 : index
    %15 = vector.load %arg5[%c0_9, %c0_10] : memref<1x128xf32, #tpu.memory_space<vmem>>, vector<1x128xf32>
    %16 = vector.broadcast %15 : vector<1x128xf32> to vector<8x128xf32>
    %17 = arith.addf %14, %16 : vector<8x128xf32>
    %18 = arith.negf %17 : vector<8x128xf32>
    %19 = math.exp %18 : vector<8x128xf32>
    %cst_11 = arith.constant 1.000000e+00 : f32
    %20 = vector.broadcast %cst_11 : f32 to vector<8x128xf32>
    %21 = arith.addf %20, %19 : vector<8x128xf32>
    %22 = arith.divf %20, %21 : vector<8x128xf32>
    %23 = arith.truncf %22 : vector<8x128xf32> to vector<8x128xbf16>
    %c0_12 = arith.constant 0 : index
    %c0_13 = arith.constant 0 : index
    %24 = vector.load %arg6[%c0_12, %c0_13] : memref<128x128xbf16, #tpu.memory_space<vmem>>, vector<128x128xbf16>
    %cst_14 = arith.constant dense<0.000000e+00> : vector<8x128xf32>
    %25 = tpu.matmul %23, %24, %cst_14 {dimension_numbers = #tpu.dot_dimension_numbers<[1], [0], [0], [1], [0, 0, 1, 1], [], []>} : vector<8x128xbf16>, vector<128x128xbf16>, vector<8x128xf32> -> vector<8x128xf32>
    %c0_15 = arith.constant 0 : index
    %c0_16 = arith.constant 0 : index
    %26 = vector.load %arg7[%c0_15, %c0_16] : memref<1x128xf32, #tpu.memory_space<vmem>>, vector<1x128xf32>
    %27 = vector.broadcast %26 : vector<1x128xf32> to vector<8x128xf32>
    %28 = arith.addf %25, %27 : vector<8x128xf32>
    %29 = arith.negf %28 : vector<8x128xf32>
    %30 = math.exp %29 : vector<8x128xf32>
    %cst_17 = arith.constant 1.000000e+00 : f32
    %31 = vector.broadcast %cst_17 : f32 to vector<8x128xf32>
    %32 = arith.addf %31, %30 : vector<8x128xf32>
    %33 = arith.divf %31, %32 : vector<8x128xf32>
    %34 = arith.truncf %33 : vector<8x128xf32> to vector<8x128xbf16>
    %c0_18 = arith.constant 0 : index
    %c0_19 = arith.constant 0 : index
    %35 = vector.load %arg8[%c0_18, %c0_19] : memref<128x128xbf16, #tpu.memory_space<vmem>>, vector<128x128xbf16>
    %cst_20 = arith.constant dense<0.000000e+00> : vector<8x128xf32>
    %36 = tpu.matmul %34, %35, %cst_20 {dimension_numbers = #tpu.dot_dimension_numbers<[1], [0], [0], [1], [0, 0, 1, 1], [], []>} : vector<8x128xbf16>, vector<128x128xbf16>, vector<8x128xf32> -> vector<8x128xf32>
    %c0_21 = arith.constant 0 : index
    %c0_22 = arith.constant 0 : index
    %37 = vector.load %arg9[%c0_21, %c0_22] : memref<1x128xf32, #tpu.memory_space<vmem>>, vector<1x128xf32>
    %38 = vector.broadcast %37 : vector<1x128xf32> to vector<8x128xf32>
    %39 = arith.addf %36, %38 : vector<8x128xf32>
    %40 = arith.truncf %39 : vector<8x128xf32> to vector<8x128xbf16>
    %c0_23 = arith.constant 0 : index
    %c0_24 = arith.constant 0 : index
    %41 = vector.load %arg10[%c0_23, %c0_24] : memref<8x128xbf16, #tpu.memory_space<vmem>>, vector<8x128xbf16>
    tpu.vector_store %arg10[%c0_23, %c0_24], %40 {strides = array<i32>} : memref<8x128xbf16, #tpu.memory_space<vmem>>, vector<8x128xbf16>,
    return
  }
  func.func @transform_0(%arg0: i32) -> (i32, i32) {
    %c0_i32 = arith.constant 0 : i32
    %c0_i32_0 = arith.constant 0 : i32
    return %arg0, %c0_i32 : i32, i32
  }
  func.func @transform_1(%arg0: i32) -> (i32, i32) {
    %c0_i32 = arith.constant 0 : i32
    %c0_i32_0 = arith.constant 0 : i32
    %c0_i32_1 = arith.constant 0 : i32
    return %c0_i32, %c0_i32_0 : i32, i32
  }
  func.func @transform_2(%arg0: i32) -> (i32, i32) {
    %c0_i32 = arith.constant 0 : i32
    %c0_i32_0 = arith.constant 0 : i32
    %c0_i32_1 = arith.constant 0 : i32
    return %c0_i32, %c0_i32_0 : i32, i32
  }
  func.func @transform_3(%arg0: i32) -> (i32, i32) {
    %c0_i32 = arith.constant 0 : i32
    %c0_i32_0 = arith.constant 0 : i32
    %c0_i32_1 = arith.constant 0 : i32
    return %c0_i32, %c0_i32_0 : i32, i32
  }
  func.func @transform_4(%arg0: i32) -> (i32, i32) {
    %c0_i32 = arith.constant 0 : i32
    %c0_i32_0 = arith.constant 0 : i32
    %c0_i32_1 = arith.constant 0 : i32
    return %c0_i32, %c0_i32_0 : i32, i32
  }
  func.func @transform_5(%arg0: i32) -> (i32, i32) {
    %c0_i32 = arith.constant 0 : i32
    %c0_i32_0 = arith.constant 0 : i32
    %c0_i32_1 = arith.constant 0 : i32
    return %c0_i32, %c0_i32_0 : i32, i32
  }
  func.func @transform_6(%arg0: i32) -> (i32, i32) {
    %c0_i32 = arith.constant 0 : i32
    %c0_i32_0 = arith.constant 0 : i32
    %c0_i32_1 = arith.constant 0 : i32
    return %c0_i32, %c0_i32_0 : i32, i32
  }
  func.func @transform_7(%arg0: i32) -> (i32, i32) {
    %c0_i32 = arith.constant 0 : i32
    %c0_i32_0 = arith.constant 0 : i32
    %c0_i32_1 = arith.constant 0 : i32
    return %c0_i32, %c0_i32_0 : i32, i32
  }
  func.func @transform_8(%arg0: i32) -> (i32, i32) {
    %c0_i32 = arith.constant 0 : i32
    %c0_i32_0 = arith.constant 0 : i32
    %c0_i32_1 = arith.constant 0 : i32
    return %c0_i32, %c0_i32_0 : i32, i32
  }
  func.func @transform_9(%arg0: i32) -> (i32, i32) {
    %c0_i32 = arith.constant 0 : i32
    %c0_i32_0 = arith.constant 0 : i32
    return %arg0, %c0_i32 : i32, i32
  }
}

</mosaic_0001>

<bundles_post_ra>
// kernel: mnist_net_forward.1
= control target key start
LH: loop header
LB: loop body
LE: loop exit
PB: predicated region body
PF: predicated region fallthrough
CT: control target
= control target key end

     0   :  { %14 = vsyncpa [#allocation3], 0  ;;  %s1670_s0 = inlined_call_operand.hbm [shape: f32[8,784], index: 0, kind: input, shape index: {}]   ;;  %s1671_s1 = inlined_call_operand.hbm [shape: bf16[784,128], index: 1, kind: input, shape index: {}]   ;;  %s1672_s2 = inlined_call_operand.vmem [shape: f32[1,128], index: 2, kind: input, shape index: {}]   ;;  %s1673_s3 = inlined_call_operand.hbm [shape: bf16[128,128], index: 3, kind: input, shape index: {}]   ;;  %s1674_s4 = inlined_call_operand.vmem [shape: f32[1,128], index: 4, kind: input, shape index: {}]   ;;  %s1675_s5 = inlined_call_operand.hbm [shape: bf16[128,128], index: 5, kind: input, shape index: {}]   ;;  %s1676_s6 = inlined_call_operand.vmem [shape: f32[1,128], index: 6, kind: input, shape index: {}]   ;;  %s1677_s7 = inlined_call_operand.hbm [shape: bf16[128,128], index: 7, kind: input, shape index: {}]   ;;  %s1678_s8 = inlined_call_operand.vmem [shape: f32[1,128], index: 8, kind: input, shape index: {}]   ;;  %s1679_s9 = inlined_call_operand.vmem [shape: bf16[8,128], index: 9, kind: output, shape index: {}]  }
   0x1   :  { %15 = vsyncpa [#allocation5], 0 }
   0x2   :  { %16 = vsyncpa [#allocation8], 0  ;;  %s1491_s30 = smov [#allocation4]   ;;  %s1375_s13 = scalar_lea.hbm %s1671_s1, 6272 }
   0x3   :  { %s32_s10 = sshll.u32 %s1491_s30, 4  ;;  %p1376_p0 = scmp.ne.s32.totalorder %s1671_s1, %s1375_s13  ;;  %s33_s10 = int_to_ptr.vmem [resolvable:$true] %s32_s10 }
   0x4   :  { %p1379_p1 = scmp.lt.u32.totalorder %s1375_s13, %s1671_s1 }
   0x6   :  { %p1381_p2 = pnand %p1379_p1, %p1376_p0 }
   0x8   :  { %1384 = shalt.err (!%p1381_p2)
}
   0x9   :  { %s1385_s18 = scalar_lea.vmem %s33_s10, 6272  ;;  %p1390_p4 = scmp.lt.s32.totalorder %s33_s10, %s33_s10 }
   0xa   :  { %p1386_p3 = scmp.ne.s32.totalorder %s33_s10, %s1385_s18  ;;  %p1391_p5 = scmp.lt.s32.totalorder %s1385_s18, %s1385_s18 }
   0xc   :  { %p1392_p6 = por %p1391_p5, %p1390_p4 }
   0xe   :  { %p1393_p7 = pnand %p1392_p6, %p1386_p3 }
  0x10   :  { %1396 = shalt.err (!%p1393_p7)
}
  0x11   :  { %s1492_s19 = smov 64   ;;  %s1493_s20 = smov 4  }
  0x12   :  { %38 = dma.hbm_to_vmem [thread:$0]  %s1671_s1, 6272, %s33_s10, [#allocation5], %s1492_s19, %s1492_s19, %s1493_s20  }
  0x13   :  { %s1494_s23 = smov [#allocation7]   ;;  %s1495_s25 = smov [#allocation2]  }
  0x14   :  { %s60_s24 = sshll.u32 %s1494_s23, 4  ;;  %s23_s26 = sshll.u32 %s1495_s25, 4  ;;  %s61_s24 = int_to_ptr.vmem [resolvable:$true] %s60_s24  ;;  %s24_s26 = int_to_ptr.vmem [resolvable:$true] %s23_s26 }
  0x15   :  { %s1397_s29 = scalar_lea.hbm %s1675_s5, 1024 }
  0x16   :  { %p1398_p8 = scmp.ne.s32.totalorder %s1675_s5, %s1397_s29  ;;  %p1401_p9 = scmp.lt.u32.totalorder %s1397_s29, %s1675_s5 }
  0x18   :  { %p1403_p10 = pnand %p1401_p9, %p1398_p8 }
  0x1a   :  { %1406 = shalt.err (!%p1403_p10)
}
  0x1b   :  { %s1407_s1 = scalar_lea.vmem %s61_s24, 1024  ;;  %p1412_p12 = scmp.lt.s32.totalorder %s61_s24, %s61_s24 }
  0x1c   :  { %p1408_p11 = scmp.ne.s32.totalorder %s61_s24, %s1407_s1  ;;  %p1413_p13 = scmp.lt.s32.totalorder %s1407_s1, %s1407_s1 }
  0x1e   :  { %p1414_p0 = por %p1413_p13, %p1412_p12 }
  0x20   :  { %p1415_p1 = pnand %p1414_p0, %p1408_p11 }
  0x22   :  { %1418 = shalt.err (!%p1415_p1)
}
  0x23   :  { %66 = dma.hbm_to_vmem [thread:$0]  %s1675_s5, 1024, %s61_s24, [#allocation8], %s1492_s19, %s1492_s19, %s1493_s20  }
  0x24   :  { %s1419_s17 = scalar_lea.hbm %s1670_s0, 896 }
  0x25   :  { %p1420_p2 = scmp.ne.s32.totalorder %s1670_s0, %s1419_s17  ;;  %p1423_p3 = scmp.lt.u32.totalorder %s1419_s17, %s1670_s0 }
  0x27   :  { %p1425_p4 = pnand %p1423_p3, %p1420_p2 }
  0x29   :  { %1428 = shalt.err (!%p1425_p4)
}
  0x2a   :  { %s1429_s25 = scalar_lea.vmem %s24_s26, 896  ;;  %p1434_p6 = scmp.lt.s32.totalorder %s24_s26, %s24_s26 }
  0x2b   :  { %p1430_p5 = scmp.ne.s32.totalorder %s24_s26, %s1429_s25  ;;  %p1435_p7 = scmp.lt.s32.totalorder %s1429_s25, %s1429_s25 }
  0x2d   :  { %p1436_p8 = por %p1435_p7, %p1434_p6 }
  0x2f   :  { %p1437_p9 = pnand %p1436_p8, %p1430_p5 }
  0x31   :  { %1440 = shalt.err (!%p1437_p9)
}
  0x32   :  { %26 = dma.hbm_to_vmem [thread:$0]  %s1670_s0, 896, %s24_s26, [#allocation3]  }
  0x33   :  { %s1496_s27 = smov [#allocation6]   ;;  %s1497_s29 = smov [#allocation9]  }
  0x34   :  { %s46_s28 = sshll.u32 %s1496_s27, 4  ;;  %s74_s30 = sshll.u32 %s1497_s29, 4  ;;  %s47_s28 = int_to_ptr.vmem [resolvable:$true] %s46_s28  ;;  %s75_s30 = int_to_ptr.vmem [resolvable:$true] %s74_s30 }
  0x35   :  { %s1441_s13 = scalar_lea.hbm %s1673_s3, 1024 }
  0x36   :  { %p1442_p10 = scmp.ne.s32.totalorder %s1673_s3, %s1441_s13  ;;  %p1445_p11 = scmp.lt.u32.totalorder %s1441_s13, %s1673_s3 }
  0x38   :  { %p1447_p12 = pnand %p1445_p11, %p1442_p10 }
  0x3a   :  { %1450 = shalt.err (!%p1447_p12)
}
  0x3b   :  { %s1451_s0 = scalar_lea.vmem %s47_s28, 1024  ;;  %p1456_p0 = scmp.lt.s32.totalorder %s47_s28, %s47_s28 }
  0x3c   :  { %p1452_p13 = scmp.ne.s32.totalorder %s47_s28, %s1451_s0  ;;  %p1457_p1 = scmp.lt.s32.totalorder %s1451_s0, %s1451_s0 }
  0x3e   :  { %p1458_p2 = por %p1457_p1, %p1456_p0 }
  0x40   :  { %p1459_p3 = pnand %p1458_p2, %p1452_p13 }
  0x42   :  { %1462 = shalt.err (!%p1459_p3)
}
  0x43   :  { %52 = dma.hbm_to_vmem [thread:$0]  %s1673_s3, 1024, %s47_s28, [#allocation5], %s1492_s19, %s1492_s19, %s1493_s20  }
  0x44   :  { %s1463_s21 = scalar_lea.hbm %s1677_s7, 1024 }
  0x45   :  { %p1464_p4 = scmp.ne.s32.totalorder %s1677_s7, %s1463_s21  ;;  %p1467_p5 = scmp.lt.u32.totalorder %s1463_s21, %s1677_s7 }
  0x47   :  { %p1469_p6 = pnand %p1467_p5, %p1464_p4 }
  0x49   :  { %1472 = shalt.err (!%p1469_p6)
}
  0x4a   :  { %s1473_s24 = scalar_lea.vmem %s75_s30, 1024  ;;  %p1478_p8 = scmp.lt.s32.totalorder %s75_s30, %s75_s30 }
  0x4b   :  { %p1474_p7 = scmp.ne.s32.totalorder %s75_s30, %s1473_s24  ;;  %p1479_p9 = scmp.lt.s32.totalorder %s1473_s24, %s1473_s24 }
  0x4d   :  { %p1480_p10 = por %p1479_p9, %p1478_p8 }
  0x4f   :  { %p1481_p11 = pnand %p1480_p10, %p1474_p7 }
  0x51   :  { %1484 = shalt.err (!%p1481_p11)
}
  0x52   :  { %80 = dma.hbm_to_vmem [thread:$0]  %s1677_s7, 1024, %s75_s30, [#allocation8], %s1492_s19, %s1492_s19, %s1493_s20  }
  0x53   :  { %1485 = dma.done.wait [#allocation3], 896  }
  0x54   :  { %1486 = vsyncadd [#allocation3], 4294966400 }
  0x55   :  { %1487 = dma.done.wait [#allocation5], 7296  }
  0x56   :  { %1488 = vsyncadd [#allocation5], 4294960000 }
  0x57   :  { %1489 = dma.done.wait [#allocation8], 2048  }
  0x58   :  { %1490 = vsyncadd [#allocation8], 4294965248  ;;  %v1290_v0 = vld [vmem:[#allocation4 + $0x40] sm:$0xff]   ;;  %v1294_v4 = vld [vmem:[#allocation4 + $0x48] sm:$0xff]   ;;  %v1498_v44 = vmov 0.0   ;;  %vm1499_vm0 = vmmov 0  }
  0x59   :  { %v1291_v1 = vld [vmem:[#allocation4] sm:$0xff]   ;;  %1120 = vmatprep.subr.bf16.mxu0 %v1290_v0  ;;  %v1295_v5 = vld [vmem:[#allocation4 + $0x8] sm:$0xff]   ;;  %v1298_v8 = vld [vmem:[#allocation4 + $0x50] sm:$0xff]   ;;  %vm512_vm1 = vcmask 130048  }
  0x5a   :  { %v1292_v2 = vld [vmem:[#allocation4 + $0xc0] sm:$0xff]   ;;  %1121 = vmatpush3.bf16.msra.mxu0 %v1291_v1  ;;  %v1296_v6 = vld [vmem:[#allocation4 + $0xc8] sm:$0xff]   ;;  %v1299_v9 = vld [vmem:[#allocation4 + $0x10] sm:$0xff]  }
  0x5b   :  { %v1293_v3 = vld [vmem:[#allocation4 + $0x80] sm:$0xff]   ;;  %1142 = vmatprep.subr.bf16.mxu1 %v1292_v2  ;;  %1122 = vmatprep.subr.bf16.mxu0 %v1294_v4  ;;  %v1297_v7 = vld [vmem:[#allocation4 + $0x88] sm:$0xff]   ;;  %v1300_v10 = vld [vmem:[#allocation4 + $0xd0] sm:$0xff]  }
  0x5c   :  { %1143 = vmatpush3.bf16.msra.mxu1 %v1293_v3  ;;  %v1301_v11 = vld [vmem:[#allocation4 + $0x90] sm:$0xff]   ;;  %v1302_v12 = vld [vmem:[#allocation4 + $0x58] sm:$0xff]   ;;  %v1306_v16 = vld [vmem:[#allocation4 + $0x60] sm:$0xff]  }
  0x5d   :  { %1144 = vmatprep.subr.bf16.mxu1 %v1296_v6  ;;  %v1303_v13 = vld [vmem:[#allocation4 + $0x18] sm:$0xff]   ;;  %v1307_v17 = vld [vmem:[#allocation4 + $0x20] sm:$0xff]   ;;  %v1310_v20 = vld [vmem:[#allocation4 + $0x68] sm:$0xff]  }
  0x5e   :  { %1123 = vmatpush3.bf16.msra.mxu0 %v1295_v5  ;;  %v1304_v14 = vld [vmem:[#allocation4 + $0xd8] sm:$0xff]   ;;  %v1308_v18 = vld [vmem:[#allocation4 + $0xe0] sm:$0xff]   ;;  %v1311_v21 = vld [vmem:[#allocation4 + $0x28] sm:$0xff]  }
  0x5f   :  { %1124 = vmatprep.subr.bf16.mxu0 %v1298_v8  ;;  %v1305_v15 = vld [vmem:[#allocation4 + $0x98] sm:$0xff]   ;;  %v1309_v19 = vld [vmem:[#allocation4 + $0xa0] sm:$0xff]   ;;  %v1312_v22 = vld [vmem:[#allocation4 + $0xe8] sm:$0xff]  }
  0x60   :  { %1145 = vmatpush3.bf16.msra.mxu1 %v1297_v7  ;;  %v1313_v23 = vld [vmem:[#allocation4 + $0xa8] sm:$0xff]   ;;  %v1314_v24 = vld [vmem:[#allocation4 + $0x70] sm:$0xff]   ;;  %v1318_v28 = vld [vmem:[#allocation4 + $0x78] sm:$0xff]  }
  0x61   :  { %1146 = vmatprep.subr.bf16.mxu1 %v1300_v10  ;;  %v1315_v25 = vld [vmem:[#allocation4 + $0x30] sm:$0xff]   ;;  %v1319_v29 = vld [vmem:[#allocation4 + $0x38] sm:$0xff]   ;;  %v99_v34 = vld [vmem:[#allocation2] sm:$0xff] }
  0x62   :  { %1125 = vmatpush3.bf16.msra.mxu0 %v1299_v9  ;;  %v1316_v26 = vld [vmem:[#allocation4 + $0xf0] sm:$0xff]   ;;  %v1320_v30 = vld [vmem:[#allocation4 + $0xf8] sm:$0xff]   ;;  %v106_v35 = vpack.c.bf16 %v99_v34, %v99_v34  ;;  %v1322_v36 = vld [vmem:[#allocation4 + $0x140] sm:$0xff]  }
  0x63   :  { %1126 = vmatprep.subr.bf16.mxu0 %v1302_v12  ;;  %v1317_v27 = vld [vmem:[#allocation4 + $0xb0] sm:$0xff]   ;;  %v1321_v33 = vld [vmem:[#allocation4 + $0xb8] sm:$0xff]   ;;  %v102_v37 = vld [vmem:[#allocation2 + $0x18] sm:$0xff] }
  0x64   :  { %1147 = vmatpush3.bf16.msra.mxu1 %v1301_v11  ;;  %v100_v31 = vld [vmem:[#allocation2 + $0x8] sm:$0xff]  ;;  %v109_v38 = vpack.c.bf16 %v102_v37, %v102_v37  ;;  %v1323_v39 = vld [vmem:[#allocation4 + $0x100] sm:$0xff]   ;;  %v101_v40 = vld [vmem:[#allocation2 + $0x10] sm:$0xff] }
  0x65   :  { %1148 = vmatprep.subr.bf16.mxu1 %v1304_v14  ;;  %v107_v32 = vpack.c.bf16 %v100_v31, %v100_v31  ;;  %v108_v41 = vpack.c.bf16 %v101_v40, %v101_v40  ;;  %v1324_v42 = vld [vmem:[#allocation4 + $0x148] sm:$0xff]   ;;  %v1326_v45 = vld [vmem:[#allocation4 + $0x150] sm:$0xff]   ;;  %v1328_v47 = vld [vmem:[#allocation4 + $0x158] sm:$0xff]  }
  0x66   :  { %1127 = vmatpush3.bf16.msra.mxu0 %v1303_v13  ;;  %588 = vmatprep.mubr.bf16.mxu1 %v109_v38  ;;  %v1325_v43 = vld [vmem:[#allocation4 + $0x108] sm:$0xff]   ;;  %v1327_v46 = vld [vmem:[#allocation4 + $0x110] sm:$0xff]   ;;  %v1329_v48 = vld [vmem:[#allocation4 + $0x118] sm:$0xff]  }
  0x67   :  { %1128 = vmatprep.subr.bf16.mxu0 %v1306_v16  ;;  %548 = vmatprep.mubr.bf16.mxu0 %v107_v32  ;;  %v1330_v49 = vld [vmem:[#allocation4 + $0x160] sm:$0xff]   ;;  %v1332_v51 = vld [vmem:[#allocation4 + $0x168] sm:$0xff]   ;;  %v104_v54 = vld [vmem:[#allocation2 + $0x28] sm:$0xff] }
  0x68   :  { %1149 = vmatpush3.bf16.msra.mxu1 %v1305_v15  ;;  %v1331_v50 = vld [vmem:[#allocation4 + $0x120] sm:$0xff]   ;;  %v1333_v52 = vld [vmem:[#allocation4 + $0x128] sm:$0xff]   ;;  %v1334_v55 = vld [vmem:[#allocation4 + $0x170] sm:$0xff]   ;;  %v111_v56 = vpack.c.bf16 %v104_v54, %v104_v54 }
  0x69   :  { %1150 = vmatprep.subr.bf16.mxu1 %v1308_v18  ;;  %v1338_v53 = vld [vmem:[#allocation4 + $0x180] sm:$0xff]   ;;  %v105_v57 = vld [vmem:[#allocation2 + $0x30] sm:$0xff]  ;;  %v1335_v59 = vld [vmem:[#allocation4 + $0x130] sm:$0xff]  }
  0x6a   :  { %1129 = vmatpush3.bf16.msra.mxu0 %v1307_v17  ;;  %v112_v58 = vpack.c.bf16 %v105_v57, %v105_v57  ;;  %v1336_v60 = vld [vmem:[#allocation4 + $0x178] sm:$0xff]   ;;  %v103_v62 = vld [vmem:[#allocation2 + $0x20] sm:$0xff]  ;;  %v1340_v1 = vld [vmem:[#allocation6 + $0x8] sm:$0xff]  }
  0x6b   :  { %1130 = vmatprep.subr.bf16.mxu0 %v1310_v20  ;;  %v1337_v61 = vld [vmem:[#allocation4 + $0x138] sm:$0xff]   ;;  %v110_v63 = vpack.c.bf16 %v103_v62, %v103_v62  ;;  %v1339_v0 = vld [vmem:[#allocation6] sm:$0xff]   ;;  %v1342_v3 = vld [vmem:[#allocation6 + $0x18] sm:$0xff]  }
  0x6c   :  { %1151 = vmatpush3.bf16.msra.mxu1 %v1309_v19  ;;  %v1341_v2 = vld [vmem:[#allocation6 + $0x10] sm:$0xff]   ;;  %v1343_v4 = vld [vmem:[#allocation6 + $0x20] sm:$0xff]   ;;  %v1344_v5 = vld [vmem:[#allocation6 + $0x28] sm:$0xff]  }
  0x6d   :  { %1152 = vmatprep.subr.bf16.mxu1 %v1312_v22  ;;  %v1345_v6 = vld [vmem:[#allocation6 + $0x30] sm:$0xff]   ;;  %v1346_v7 = vld [vmem:[#allocation6 + $0x38] sm:$0xff]   ;;  %v1039_v9 = vld [vmem:[%s1672_s2] ss:$0 sm:$0xff] }
  0x6e   :  { %1131 = vmatpush3.bf16.msra.mxu0 %v1311_v21  ;;  %v1347_v37 = vld [vmem:[#allocation7] sm:$0xff]   ;;  %v1348_v38 = vld [vmem:[#allocation7 + $0x8] sm:$0xff]   ;;  %v1350_v40 = vld [vmem:[#allocation7 + $0x18] sm:$0xff]  }
  0x6f   :  { %1132 = vmatprep.subr.bf16.mxu0 %v1314_v24  ;;  %v1355_v57 = vld [vmem:[#allocation9] sm:$0xff]   ;;  %v1360_v62 = vld [vmem:[#allocation9 + $0x28] sm:$0xff]  }
  0x70   :  { %1153 = vmatpush3.bf16.msra.mxu1 %v1313_v23 }
  0x71   :  { %1154 = vmatprep.subr.bf16.mxu1 %v1316_v26 }
  0x72   :  { %1133 = vmatpush3.bf16.msra.mxu0 %v1315_v25 }
  0x73   :  { %1134 = vmatprep.subr.bf16.mxu0 %v1318_v28 }
  0x74   :  { %1155 = vmatpush3.bf16.msra.mxu1 %v1317_v27 }
  0x75   :  { %1156 = vmatprep.subr.bf16.mxu1 %v1320_v30 }
  0x76   :  { %1135 = vmatpush3.bf16.msra.mxu0 %v1319_v29 }
  0x77   :  { %1164 = vmatprep.subr.bf16.mxu0 %v1322_v36 }
  0x78   :  { %1157 = vmatpush3.bf16.msra.mxu1 %v1321_v33 }
  0x79   :  { %549 = vmatmul.mubr.bf16.vlgmr.msra.gmra.mrb[0].mxu0 %v106_v35  ;;  %1215 = vmatprep.subr.bf16.mxu1 %v1498_v44 }
  0x7a   :  { %1165 = vmatpush3.bf16.msra.mxu0 %v1323_v39  ;;  %628 = vmatprep.mubr.bf16.mxu0 %v111_v56  ;;  %v1349_v39 = vld [vmem:[#allocation7 + $0x10] sm:$0xff]  }
  0x7b   :  { %589 = vmatmul.mubr.bf16.vlgmr.msra.gmra.mrb[0].mxu1 %v108_v41  ;;  %1166 = vmatprep.subr.bf16.mxu0 %v1324_v42  ;;  %v1351_v41 = vld [vmem:[#allocation7 + $0x20] sm:$0xff]   ;;  %v1352_v42 = vld [vmem:[#allocation7 + $0x28] sm:$0xff]  }
  0x7c   :  { %1217 = vmatprep.mubr.msk.bf16.mxu1 %vm1499_vm0, %v1498_v44  ;;  %1216 = vmatpush3.bf16.msra.mxu1 %v1338_v53 }
  0x7d   :  { %1221 = vmatprep.subr.bf16.mxu1 %v1498_v44 }
  0x7e   :  { %1167 = vmatpush3.bf16.msra.mxu0 %v1325_v43  ;;  %v1353_v43 = vld [vmem:[#allocation7 + $0x30] sm:$0xff]  }
  0x7f   :  { %1168 = vmatprep.subr.bf16.mxu0 %v1326_v45  ;;  %v1354_v45 = vld [vmem:[#allocation7 + $0x38] sm:$0xff]  }
  0x82   :  { %1169 = vmatpush3.bf16.msra.mxu0 %v1327_v46  ;;  %v1091_v46 = vld [vmem:[%s1674_s4] ss:$0 sm:$0xff] }
  0x83   :  { %1170 = vmatprep.subr.bf16.mxu0 %v1328_v47  ;;  %1218 = vmatmul.mubr.msk.bf16.vlgmr.msra.gmra.mrb[4].mxu1 %vm512_vm1, %v112_v58  ;;  %v1356_v58 = vld [vmem:[#allocation9 + $0x8] sm:$0xff]  }
  0x84   :  { %1237 = vmatprep.mubr.msk.bf16.mxu1 %vm1499_vm0, %v1498_v44  ;;  %1222 = vmatpush3.bf16.msra.mxu1 %v1339_v0  ;;  %v1362_v0 = vld [vmem:[#allocation9 + $0x38] sm:$0xff]  }
  0x85   :  { %1223 = vmatprep.subr.bf16.mxu1 %v1498_v44 }
  0x86   :  { %1171 = vmatpush3.bf16.msra.mxu0 %v1329_v48 }
  0x87   :  { %1172 = vmatprep.subr.bf16.mxu0 %v1330_v49 }
  0x88   :  { %1224 = vmatpush3.bf16.msra.mxu1 %v1340_v1  ;;  %v1101_v1 = vld [vmem:[%s1676_s6] ss:$0 sm:$0xff] }
  0x89   :  { %1225 = vmatprep.subr.bf16.mxu1 %v1498_v44 }
  0x8a   :  { %1173 = vmatpush3.bf16.msra.mxu0 %v1331_v50 }
  0x8b   :  { %1174 = vmatprep.subr.bf16.mxu0 %v1332_v51 }
  0x8c   :  { %1226 = vmatpush3.bf16.msra.mxu1 %v1341_v2 }
  0x8d   :  { %1227 = vmatprep.subr.bf16.mxu1 %v1498_v44 }
  0x8e   :  { %1175 = vmatpush3.bf16.msra.mxu0 %v1333_v52 }
  0x8f   :  { %1176 = vmatprep.subr.bf16.mxu0 %v1334_v55 }
  0x90   :  { %1228 = vmatpush3.bf16.msra.mxu1 %v1342_v3 }
  0x91   :  { %1229 = vmatprep.subr.bf16.mxu1 %v1498_v44 }
  0x92   :  { %1177 = vmatpush3.bf16.msra.mxu0 %v1335_v59  ;;  %v1357_v59 = vld [vmem:[#allocation9 + $0x10] sm:$0xff]  }
  0x93   :  { %1178 = vmatprep.subr.bf16.mxu0 %v1336_v60  ;;  %v1358_v60 = vld [vmem:[#allocation9 + $0x18] sm:$0xff]  }
  0x94   :  { %1230 = vmatpush3.bf16.msra.mxu1 %v1343_v4 }
  0x95   :  { %1231 = vmatprep.subr.bf16.mxu1 %v1498_v44 }
  0x96   :  { %1179 = vmatpush3.bf16.msra.mxu0 %v1337_v61  ;;  %v1359_v61 = vld [vmem:[#allocation9 + $0x20] sm:$0xff]  }
  0x97   :  { %1241 = vmatprep.subr.bf16.mxu0 %v1498_v44 }
  0x98   :  { %1232 = vmatpush3.bf16.msra.mxu1 %v1344_v5 }
  0x99   :  { %629 = vmatmul.mubr.bf16.vlgmr.msra.gmra.mrb[4].mxu0 %v110_v63  ;;  %1233 = vmatprep.subr.bf16.mxu1 %v1498_v44  ;;  %v1361_v63 = vld [vmem:[#allocation9 + $0x30] sm:$0xff]  }
  0x9a   :  { %1257 = vmatprep.mubr.msk.bf16.mxu0 %vm1499_vm0, %v1498_v44  ;;  %1242 = vmatpush3.bf16.msra.mxu0 %v1347_v37 }
  0x9b   :  { %1243 = vmatprep.subr.bf16.mxu0 %v1498_v44 }
  0x9c   :  { %1234 = vmatpush3.bf16.msra.mxu1 %v1345_v6 }
  0x9d   :  { %1235 = vmatprep.subr.bf16.mxu1 %v1498_v44 }
  0x9e   :  { %1244 = vmatpush3.bf16.msra.mxu0 %v1348_v38 }
  0x9f   :  { %1245 = vmatprep.subr.bf16.mxu0 %v1498_v44 }
  0xa0   :  { %1236 = vmatpush3.bf16.msra.mxu1 %v1346_v7 }
  0xa1   :  { %1261 = vmatprep.subr.bf16.mxu1 %v1498_v44 }
  0xa2   :  { %1246 = vmatpush3.bf16.msra.mxu0 %v1349_v39 }
  0xa3   :  { %1247 = vmatprep.subr.bf16.mxu0 %v1498_v44 }
  0xa6   :  { %1248 = vmatpush3.bf16.msra.mxu0 %v1350_v40 }
  0xa7   :  { %1249 = vmatprep.subr.bf16.mxu0 %v1498_v44 }
  0xaa   :  { %1250 = vmatpush3.bf16.msra.mxu0 %v1351_v41 }
  0xab   :  { %1251 = vmatprep.subr.bf16.mxu0 %v1498_v44 }
  0xae   :  { %1252 = vmatpush3.bf16.msra.mxu0 %v1352_v42 }
  0xaf   :  { %1253 = vmatprep.subr.bf16.mxu0 %v1498_v44 }
  0xb2   :  { %1254 = vmatpush3.bf16.msra.mxu0 %v1353_v43 }
  0xb3   :  { %1255 = vmatprep.subr.bf16.mxu0 %v1498_v44 }
  0xb6   :  { %1256 = vmatpush3.bf16.msra.mxu0 %v1354_v45 }
 0x14c   :  { %v1136_v8 = vpop.f32.mrb[0].mxu0 }
 0x14d   :  { %v1137_v10 = vpop.f32.mrb[1].mxu0 }
 0x14e   :  { %v1138_v11 = vadd.f32 %v1137_v10, %v1136_v8  ;;  %v1139_v12 = vpop.f32.mrb[2].mxu0  ;;  %v1158_v13 = vpop.f32.mrb[0].mxu1 }
 0x14f   :  { %v1140_v14 = vpop.f32.mrb[3].mxu0  ;;  %v1159_v16 = vpop.f32.mrb[1].mxu1 }
 0x150   :  { %v551_v15 = vadd.f32 %v1138_v11, %v1039_v9  ;;  %v1160_v17 = vadd.f32 %v1159_v16, %v1158_v13  ;;  %v1161_v18 = vpop.f32.mrb[2].mxu1 }
 0x151   :  { %v1162_v19 = vpop.f32.mrb[3].mxu1 }
 0x152   :  { %v591_v20 = vadd.f32 %v1160_v17, %v551_v15 }
 0x156   :  { %v670_v21 = vpop.f32.mrb[4].mxu1 }
 0x157   :  { %v1219_v22 = vpop.f32.mrb[5].mxu1 }
 0x158   :  { %v673_v23 = vpop.f32.mrb[6].mxu1 }
 0x159   :  { %v1220_v24 = vpop.f32.mrb[7].mxu1 }
 0x16c   :  { %v1180_v25 = vpop.f32.mrb[4].mxu0 }
 0x16d   :  { %v1181_v26 = vpop.f32.mrb[5].mxu0 }
 0x16e   :  { %v1182_v27 = vadd.f32 %v1181_v26, %v1180_v25  ;;  %v1183_v28 = vpop.f32.mrb[6].mxu0 }
 0x16f   :  { %v1184_v29 = vpop.f32.mrb[7].mxu0 }
 0x170   :  { %v631_v30 = vadd.f32 %v1182_v27, %v591_v20 }
 0x172   :  { %v671_v31 = vadd.f32 %v670_v21, %v631_v30 }
 0x174   :  { %v1090_v32 = vmul.f32 -1.442695, %v671_v31 }
 0x176   :  { %1363 = vpow2.f32 %v1090_v32 }
 0x180   :  { %v1364_v33 = vpop.eup %1363 }
 0x181   :  { %v679_v34 = vadd.f32 1.0, %v1364_v33 }
 0x183   :  { %1365 = vrcp.f32 %v679_v34 }
 0x18d   :  { %v1366_v35 = vpop.eup %1365 }
 0x18e   :  { %v682_v36 = vpack.c.bf16 %v1366_v35, %v1366_v35 }
 0x190   :  { %1238 = vmatmul.mubr.bf16.vlgmr.msra.gmra.mrb[8].mxu1 %v682_v36 }
 0x191   :  { %1277 = vmatprep.mubr.msk.bf16.mxu1 %vm1499_vm0, %v1498_v44  ;;  %1262 = vmatpush3.bf16.msra.mxu1 %v1355_v57 }
 0x192   :  { %1263 = vmatprep.subr.bf16.mxu1 %v1498_v44 }
 0x195   :  { %1264 = vmatpush3.bf16.msra.mxu1 %v1356_v58 }
 0x196   :  { %1265 = vmatprep.subr.bf16.mxu1 %v1498_v44 }
 0x199   :  { %1266 = vmatpush3.bf16.msra.mxu1 %v1357_v59 }
 0x19a   :  { %1267 = vmatprep.subr.bf16.mxu1 %v1498_v44 }
 0x19d   :  { %1268 = vmatpush3.bf16.msra.mxu1 %v1358_v60 }
 0x19e   :  { %1269 = vmatprep.subr.bf16.mxu1 %v1498_v44 }
 0x1a1   :  { %1270 = vmatpush3.bf16.msra.mxu1 %v1359_v61 }
 0x1a2   :  { %1271 = vmatprep.subr.bf16.mxu1 %v1498_v44 }
 0x1a5   :  { %1272 = vmatpush3.bf16.msra.mxu1 %v1360_v62 }
 0x1a6   :  { %1273 = vmatprep.subr.bf16.mxu1 %v1498_v44 }
 0x1a9   :  { %1274 = vmatpush3.bf16.msra.mxu1 %v1361_v63 }
 0x1aa   :  { %1275 = vmatprep.subr.bf16.mxu1 %v1498_v44  ;;  %v1111_v44 = vld [vmem:[%s1678_s8] ss:$0 sm:$0xff] }
 0x1ad   :  { %1276 = vmatpush3.bf16.msra.mxu1 %v1362_v0 }
 0x263   :  { %v788_v47 = vpop.f32.mrb[8].mxu1 }
 0x264   :  { %v789_v48 = vadd.f32 %v1091_v46, %v788_v47  ;;  %v1239_v49 = vpop.f32.mrb[9].mxu1 }
 0x265   :  { %v791_v50 = vpop.f32.mrb[10].mxu1 }
 0x266   :  { %v1100_v51 = vmul.f32 -1.442695, %v789_v48  ;;  %v1240_v52 = vpop.f32.mrb[11].mxu1 }
 0x268   :  { %1367 = vpow2.f32 %v1100_v51 }
 0x272   :  { %v1368_v53 = vpop.eup %1367 }
 0x273   :  { %v797_v54 = vadd.f32 1.0, %v1368_v53 }
 0x275   :  { %1369 = vrcp.f32 %v797_v54 }
 0x27f   :  { %v1370_v55 = vpop.eup %1369 }
 0x280   :  { %v800_v56 = vpack.c.bf16 %v1370_v55, %v1370_v55 }
 0x282   :  { %1258 = vmatmul.mubr.bf16.vlgmr.msra.gmra.mrb[8].mxu0 %v800_v56 }
 0x355   :  { %v906_v2 = vpop.f32.mrb[8].mxu0 }
 0x356   :  { %v907_v3 = vadd.f32 %v1101_v1, %v906_v2  ;;  %v1259_v4 = vpop.f32.mrb[9].mxu0 }
 0x357   :  { %v909_v5 = vpop.f32.mrb[10].mxu0 }
 0x358   :  { %v1110_v6 = vmul.f32 -1.442695, %v907_v3  ;;  %v1260_v7 = vpop.f32.mrb[11].mxu0 }
 0x35a   :  { %1371 = vpow2.f32 %v1110_v6 }
 0x364   :  { %v1372_v8 = vpop.eup %1371 }
 0x365   :  { %v915_v9 = vadd.f32 1.0, %v1372_v8 }
 0x367   :  { %1373 = vrcp.f32 %v915_v9 }
 0x371   :  { %v1374_v10 = vpop.eup %1373 }
 0x372   :  { %v918_v11 = vpack.c.bf16 %v1374_v10, %v1374_v10 }
 0x374   :  { %1278 = vmatmul.mubr.bf16.vlgmr.msra.gmra.mrb[12].mxu1 %v918_v11 }
 0x447   :  { %v1024_v12 = vpop.f32.mrb[12].mxu1 }
 0x448   :  { %v1025_v13 = vadd.f32 %v1111_v44, %v1024_v12  ;;  %v1279_v14 = vpop.f32.mrb[13].mxu1 }
 0x449   :  { %v1027_v15 = vpop.f32.mrb[14].mxu1 }
 0x44a   :  { %v1030_v16 = vpack.c.bf16 %v1025_v13, %v1025_v13  ;;  %v1280_v17 = vpop.f32.mrb[15].mxu1 }
 0x44c   :  { %1031 = vst [vmem:[%s1679_s9] sm:$0xf] %v1030_v16 }
 0x44d   :  { %1036 = vsyncpa [#allocation3], 1 }
 0x44e   :  { %1037 = vsyncpa [#allocation5], 1 }
 0x44f   :  { %1038 = vsyncpa [#allocation8], 1 }

</bundles_post_ra>
